<compile_context>
chip_gen: v7x
topology: tpu7x:2x2x1
jax: 0.10.0
libtpu: 0.0.40
codegen_flags: <defaults>
</compile_context>

<pallas_src>
import functools

import jax
import jax.numpy as jnp
from jax.experimental import pallas as pl
from jax.experimental.pallas import tpu as pltpu

# ---------------------------------------------------------------------------
# Config (mirrors Matchformer/LoFTR defaults, shrunk to toy sizes)
# ---------------------------------------------------------------------------
CFG = dict(
    coarse_stride=8,          # image -> coarse feature resolution ratio
    fine_stride=2,            # image -> fine feature resolution ratio
    d_coarse=64,              # coarse feature dim
    d_fine=32,                # fine feature dim
    match_thr=0.2,            # coarse confidence threshold
    dsmax_temperature=0.1,    # dual-softmax temperature
    fine_window=5,            # fine window size W (WW = 25)
)


# ---------------------------------------------------------------------------
# Tiling helper: largest divisor of `n` that is a multiple of `mult` and
# <= `pref`; falls back to the full dim (always a legal block size).
# ---------------------------------------------------------------------------
def _pick_tile(n, pref, mult):
    if n <= pref:
        return n
    t = (pref // mult) * mult
    while t >= mult:
        if n % t == 0:
            return t
        t -= mult
    return n


# ---------------------------------------------------------------------------
# Kernel 1: linear layer (patch-embedding "conv" done as im2col matmul)
# bf16 operands feed the MXU, f32 accumulation / bias / relu.
# ---------------------------------------------------------------------------
def _linear_kernel(x_ref, w_ref, b_ref, o_ref, *, relu):
    y = jnp.dot(x_ref[...], w_ref[...], preferred_element_type=jnp.float32)
    y = y + b_ref[...]
    if relu:
        y = jnp.maximum(y, 0.0)
    o_ref[...] = y.astype(o_ref.dtype)


def pallas_linear(x, w, b, relu=False):
    n, k = x.shape
    c = w.shape[1]
    tm = _pick_tile(n, 256, 8)
    # TODO(synk): output channel dim (32/64) is below the 128-lane width ->
    # masked stores; padding weights to 128 lanes would give unmasked vst.
    return pl.pallas_call(
        functools.partial(_linear_kernel, relu=relu),
        out_shape=jax.ShapeDtypeStruct((n, c), jnp.float32),
        grid=(n // tm,),
        in_specs=[
            pl.BlockSpec((tm, k), lambda i: (i, 0)),
            pl.BlockSpec((k, c), lambda i: (0, 0)),
            pl.BlockSpec((1, c), lambda i: (0, 0)),
        ],
        out_specs=pl.BlockSpec((tm, c), lambda i: (i, 0)),
        compiler_params=pltpu.CompilerParams(
            dimension_semantics=("parallel",)),
    )(x.astype(jnp.bfloat16), w.astype(jnp.bfloat16), b.reshape(1, c))


# ---------------------------------------------------------------------------
# Kernel 2a: coarse matching pass 1 — per-row (exact) and per-column (online)
# softmax statistics.  Grid = (batch, L0 tiles); column stats accumulate
# across the L0-tile axis (marked 'arbitrary', init via pl.when).
# ---------------------------------------------------------------------------
def _coarse_stats_kernel(f0_ref, f1_ref, rmax_ref, rsum_ref, cmax_ref,
                         csum_ref, *, inv_temp):
    ii = pl.program_id(1)
    f0 = f0_ref[0]                                   # [ti, C]  bf16
    f1 = f1_ref[0]                                   # [L1, C]  bf16
    sim = jax.lax.dot_general(
        f0, f1, (((1,), (1,)), ((), ())),
        preferred_element_type=jnp.float32) * inv_temp           # [ti, L1]

    # row stats: exact (full L1 present in this invocation)
    rmax = jnp.max(sim, axis=1, keepdims=True)                   # [ti, 1]
    rsum = jnp.sum(jnp.exp(sim - rmax), axis=1, keepdims=True)   # [ti, 1]
    rmax_ref[0] = rmax
    rsum_ref[0] = rsum

    # column stats: online softmax accumulation across L0 tiles
    @pl.when(ii == 0)
    def _():
        cmax_ref[0] = jnp.full_like(cmax_ref[0], -jnp.inf)
        csum_ref[0] = jnp.zeros_like(csum_ref[0])

    tmax = jnp.max(sim, axis=0, keepdims=True)                   # [1, L1]
    m_old = cmax_ref[0]
    m_new = jnp.maximum(m_old, tmax)
    csum_ref[0] = csum_ref[0] * jnp.exp(m_old - m_new) + \
        jnp.sum(jnp.exp(sim - m_new), axis=0, keepdims=True)
    cmax_ref[0] = m_new


# ---------------------------------------------------------------------------
# Kernel 2b: coarse matching pass 2 — recompute similarity per tile and write
# the dual-softmax confidence tile.  Grid = (batch, L0 tiles, L1 tiles), all
# parallel (no cross-tile dependency once the stats exist).
# ---------------------------------------------------------------------------
def _coarse_conf_kernel(f0_ref, f1_ref, rmax_ref, rsum_ref, cmax_ref,
                        csum_ref, conf_ref, *, inv_temp):
    f0 = f0_ref[0]                                   # [ti, C]
    f1 = f1_ref[0]                                   # [tj, C]
    sim = jax.lax.dot_general(
        f0, f1, (((1,), (1,)), ((), ())),
        preferred_element_type=jnp.float32) * inv_temp           # [ti, tj]
    rmax = rmax_ref[0]                               # [ti, 1]
    rsum = rsum_ref[0]                               # [ti, 1]
    cmax = cmax_ref[0]                               # [1, tj]
    csum = csum_ref[0]                               # [1, tj]
    # softmax(axis=1) * softmax(axis=0) = exp(2*sim - rmax - cmax)/(rsum*csum)
    num = jnp.exp(2.0 * sim - rmax - cmax)
    inv = pl.reciprocal(rsum, approx=True) * pl.reciprocal(csum, approx=True)
    conf_ref[0] = num * inv


def coarse_matching(feat_c0, feat_c1):
    b, l0, c = feat_c0.shape
    l1 = feat_c1.shape[1]
    # LoFTR: feats divided by sqrt(C) each, then sim / temperature
    inv_temp = 1.0 / (float(c) * CFG['dsmax_temperature'])
    f0 = feat_c0.astype(jnp.bfloat16)
    f1 = feat_c1.astype(jnp.bfloat16)

    # ---- pass 1: statistics ----
    ti_s = _pick_tile(l0, 256, 8)
    rmax, rsum, cmax, csum = pl.pallas_call(
        functools.partial(_coarse_stats_kernel, inv_temp=inv_temp),
        out_shape=(
            jax.ShapeDtypeStruct((b, l0, 1), jnp.float32),
            jax.ShapeDtypeStruct((b, l0, 1), jnp.float32),
            jax.ShapeDtypeStruct((b, 1, l1), jnp.float32),
            jax.ShapeDtypeStruct((b, 1, l1), jnp.float32),
        ),
        grid=(b, l0 // ti_s),
        in_specs=[
            pl.BlockSpec((1, ti_s, c), lambda bb, ii: (bb, ii, 0)),
            pl.BlockSpec((1, l1, c), lambda bb, ii: (bb, 0, 0)),
        ],
        out_specs=[
            pl.BlockSpec((1, ti_s, 1), lambda bb, ii: (bb, ii, 0)),
            pl.BlockSpec((1, ti_s, 1), lambda bb, ii: (bb, ii, 0)),
            pl.BlockSpec((1, 1, l1), lambda bb, ii: (bb, 0, 0)),
            pl.BlockSpec((1, 1, l1), lambda bb, ii: (bb, 0, 0)),
        ],
        compiler_params=pltpu.CompilerParams(
            dimension_semantics=("parallel", "arbitrary")),
    )(f0, f1)

    # ---- pass 2: normalized confidence tiles ----
    ti = _pick_tile(l0, 256, 8)
    tj = _pick_tile(l1, 512, 128)
    conf = pl.pallas_call(
        functools.partial(_coarse_conf_kernel, inv_temp=inv_temp),
        out_shape=jax.ShapeDtypeStruct((b, l0, l1), jnp.float32),
        grid=(b, l0 // ti, l1 // tj),
        in_specs=[
            pl.BlockSpec((1, ti, c), lambda bb, ii, jj: (bb, ii, 0)),
            pl.BlockSpec((1, tj, c), lambda bb, ii, jj: (bb, jj, 0)),
            pl.BlockSpec((1, ti, 1), lambda bb, ii, jj: (bb, ii, 0)),
            pl.BlockSpec((1, ti, 1), lambda bb, ii, jj: (bb, ii, 0)),
            pl.BlockSpec((1, 1, tj), lambda bb, ii, jj: (bb, 0, jj)),
            pl.BlockSpec((1, 1, tj), lambda bb, ii, jj: (bb, 0, jj)),
        ],
        out_specs=pl.BlockSpec((1, ti, tj), lambda bb, ii, jj: (bb, ii, jj)),
        compiler_params=pltpu.CompilerParams(
            dimension_semantics=("parallel", "parallel", "parallel")),
    )(f0, f1, rmax, rsum, cmax, csum)
    return conf


# ---------------------------------------------------------------------------
# Kernel 3: fine matching — correlation, softmax heatmap, spatial expectation
# Tiled over matches M; lane-dense (M, 128) output sliced to (M, 3) outside.
# ---------------------------------------------------------------------------
def _fine_kernel(f0c_ref, f1_ref, out_ref, *, win, inv_sqrt_c):
    f0c = f0c_ref[...]                               # [tm, C]
    f1 = f1_ref[...]                                 # [tm, WW, C]
    tm, ww, _ = f1.shape
    # batched mat-vec as broadcast-multiply + reduce (VPU + XLU, tiny sizes)
    sim = jnp.sum(f0c[:, None, :] * f1, axis=-1) * inv_sqrt_c    # [tm, WW]
    smax = jnp.max(sim, axis=-1, keepdims=True)
    e = jnp.exp(sim - smax)
    heat = e * pl.reciprocal(jnp.sum(e, axis=-1, keepdims=True), approx=True)

    # window-grid constants built once at (1, WW), broadcast at use
    idx = jax.lax.broadcasted_iota(jnp.float32, (1, ww), 1)
    row = jnp.floor(idx / float(win))
    col = idx - row * float(win)
    gx = 2.0 * col / float(win - 1) - 1.0            # normalized x in [-1, 1]
    gy = 2.0 * row / float(win - 1) - 1.0            # normalized y in [-1, 1]

    ex = jnp.sum(heat * gx, axis=-1, keepdims=True)  # [tm, 1]
    ey = jnp.sum(heat * gy, axis=-1, keepdims=True)
    var_x = jnp.sum(heat * gx * gx, axis=-1, keepdims=True) - ex * ex
    var_y = jnp.sum(heat * gy * gy, axis=-1, keepdims=True) - ey * ey
    std = jnp.sqrt(jnp.maximum(var_x, 1e-10)) + jnp.sqrt(jnp.maximum(var_y, 1e-10))

    # lane-dense store: (x, y, std) in lanes 0..2, zeros elsewhere
    lane = jax.lax.broadcasted_iota(jnp.int32, out_ref.shape, 1)
    out_ref[...] = jnp.where(lane == 0, ex,
                   jnp.where(lane == 1, ey,
                   jnp.where(lane == 2, std, 0.0)))


def fine_matching(f0_center, feat_f1_unfold):
    m, ww, c = feat_f1_unfold.shape
    win = int(round(ww ** 0.5))
    tm = _pick_tile(m, 512, 8)
    out = pl.pallas_call(
        functools.partial(_fine_kernel, win=win, inv_sqrt_c=1.0 / (c ** 0.5)),
        out_shape=jax.ShapeDtypeStruct((m, 128), jnp.float32),
        grid=(m // tm,),
        in_specs=[
            pl.BlockSpec((tm, c), lambda i: (i, 0)),
            pl.BlockSpec((tm, ww, c), lambda i: (i, 0, 0)),
        ],
        out_specs=pl.BlockSpec((tm, 128), lambda i: (i, 0)),
        compiler_params=pltpu.CompilerParams(
            dimension_semantics=("parallel",)),
    )(f0_center, feat_f1_unfold)
    return out[:, :3]                                # (x, y, std)


# ---------------------------------------------------------------------------
# Backbone (Pallas matmuls; im2col in glue)
# ---------------------------------------------------------------------------
def patch_embed(x_nhwc, patch, w, b, relu):
    bsz, h, wdt, c = x_nhwc.shape
    ho, wo = h // patch, wdt // patch
    x = x_nhwc.reshape(bsz, ho, patch, wo, patch, c)
    x = x.transpose(0, 1, 3, 2, 4, 5).reshape(bsz * ho * wo, patch * patch * c)
    y = pallas_linear(x, w, b, relu=relu)
    return y.reshape(bsz, ho, wo, -1)


def backbone(images_nchw, params):
    # TODO(synk): the real Matchformer backbone is a hierarchical attention
    # transformer; approximated here by two strided patch-embedding
    # convolutions (stride 2 -> fine feats, extra stride 4 -> coarse feats).
    x = jnp.transpose(images_nchw, (0, 2, 3, 1))     # NCHW -> NHWC
    feat_f = patch_embed(x, CFG['fine_stride'],
                         params['w_f'], params['b_f'], relu=True)
    feat_c = patch_embed(feat_f, CFG['coarse_stride'] // CFG['fine_stride'],
                         params['w_c'], params['b_c'], relu=False)
    return feat_c, feat_f                            # channels-last


# ---------------------------------------------------------------------------
# FinePreprocess glue:
#  * image0 only needs the window CENTER feature -> strided slice (no unfold)
#  * image1 windows gathered directly at the matched coarse cells, avoiding
#    the 25x intermediate [B, L1, WW, C] materialization.
# TODO(synk): could be fused further into the Pallas fine kernel with scalar
# prefetch (j_ids) + manual DMA gathers from HBM.
# ---------------------------------------------------------------------------
def center_fine_feats(feat_f, hc, wc, stride):
    f = feat_f[:, 0:hc * stride:stride, 0:wc * stride:stride, :]
    return f.reshape(feat_f.shape[0] * hc * wc, feat_f.shape[-1])


def gather_fine_windows(feat_f, j_ids, wc, win, stride):
    bsz, hf, wf, c = feat_f.shape
    pad = win // 2
    fp = jnp.pad(feat_f, ((0, 0), (pad, pad), (pad, pad), (0, 0)))
    y1 = j_ids // wc                                  # [B, L0]
    x1 = j_ids % wc
    dy, dx = jnp.meshgrid(jnp.arange(win), jnp.arange(win), indexing='ij')
    dy = dy.reshape(-1)
    dx = dx.reshape(-1)                               # [WW]
    rows = y1[:, :, None] * stride + dy[None, None, :]   # [B, L0, WW]
    cols = x1[:, :, None] * stride + dx[None, None, :]
    b_idx = jnp.arange(bsz)[:, None, None]
    out = fp[b_idx, rows, cols]                       # [B, L0, WW, C]
    return out.reshape(-1, win * win, c)


# ---------------------------------------------------------------------------
# Full Matchformer forward
# ---------------------------------------------------------------------------
def matchformer_forward(image0, image1, params):
    data = {}
    bs = image0.shape[0]
    hw0_i, hw1_i = image0.shape[2:], image1.shape[2:]

    if hw0_i == hw1_i:   # shared backbone pass on concatenated batch
        feats_c, feats_f = backbone(jnp.concatenate([image0, image1], 0), params)
        feat_c0, feat_c1 = feats_c[:bs], feats_c[bs:]
        feat_f0, feat_f1 = feats_f[:bs], feats_f[bs:]
    else:
        feat_c0, feat_f0 = backbone(image0, params)
        feat_c1, feat_f1 = backbone(image1, params)

    hc0, wc0 = feat_c0.shape[1:3]
    hc1, wc1 = feat_c1.shape[1:3]
    hf0 = feat_f0.shape[1]

    # 'n c h w -> n (h w) c' (features already channels-last)
    fc0 = feat_c0.reshape(bs, hc0 * wc0, -1)
    fc1 = feat_c1.reshape(bs, hc1 * wc1, -1)

    # ---- coarse matching (tiled two-pass Pallas dual-softmax) ----
    conf = coarse_matching(fc0, fc1)                         # [B, L0, L1]
    data['conf_matrix'] = conf

    # mutual-NN + threshold selection (static-shape variant: one candidate
    # per coarse cell of image0 plus a validity mask)
    j_ids = jnp.argmax(conf, axis=2)                         # [B, L0]
    mconf = jnp.max(conf, axis=2)                            # [B, L0]
    col_max = jnp.max(conf, axis=1)                          # [B, L1]
    mutual = mconf >= jnp.take_along_axis(col_max, j_ids, axis=1)
    match_mask = (mconf > CFG['match_thr']) & mutual

    l0 = hc0 * wc0
    scale_c0 = hw0_i[0] // hc0
    scale_c1 = hw1_i[0] // hc1
    i_ids = jnp.arange(l0)
    xy0 = jnp.stack([i_ids % wc0, i_ids // wc0], -1).astype(jnp.float32) * scale_c0
    mkpts0_c = jnp.broadcast_to(xy0[None], (bs, l0, 2))
    mkpts1_c = jnp.stack([j_ids % wc1, j_ids // wc1], -1).astype(jnp.float32) * scale_c1

    # ---- fine preprocess (strided center pick + direct window gather) ----
    win = CFG['fine_window']
    stride = hf0 // hc0
    f0_center = center_fine_feats(feat_f0, hc0, wc0, stride)        # [B*L0, Cf]
    feat_f1_unfold = gather_fine_windows(feat_f1, j_ids, wc1, win, stride)
    # TODO(synk): FinePreprocess.cat_c_feat (coarse-feature merge MLP) omitted.

    # ---- fine matching (tiled Pallas expectation kernel) ----
    expec_f = fine_matching(f0_center, feat_f1_unfold)       # [M, 3] = (x, y, std)
    data['expec_f'] = expec_f

    scale_f1 = hw1_i[0] // feat_f1.shape[1]
    mkpts0_f = mkpts0_c.reshape(-1, 2)
    mkpts1_f = mkpts1_c.reshape(-1, 2) + expec_f[:, :2] * (win // 2) * scale_f1

    data.update(
        mkpts0_c=mkpts0_c.reshape(-1, 2),
        mkpts1_c=mkpts1_c.reshape(-1, 2),
        mkpts0_f=mkpts0_f,
        mkpts1_f=mkpts1_f,
        mconf=mconf.reshape(-1),
        match_mask=match_mask.reshape(-1),
    )
    return data


# ---------------------------------------------------------------------------
# Deterministic parameter init (shapes implied by the backbone approximation)
# ---------------------------------------------------------------------------
def init_params(key):
    k1, k2, k3, k4 = jax.random.split(key, 4)
    cin = 1
    p_f, d_f = CFG['fine_stride'], CFG['d_fine']
    p_c, d_c = CFG['coarse_stride'] // CFG['fine_stride'], CFG['d_coarse']
    kf = p_f * p_f * cin
    kc = p_c * p_c * d_f
    return dict(
        w_f=jax.random.normal(k1, (kf, d_f), jnp.float32) / jnp.sqrt(kf),
        b_f=0.01 * jax.random.normal(k2, (d_f,), jnp.float32),
        w_c=jax.random.normal(k3, (kc, d_c), jnp.float32) / jnp.sqrt(kc),
        b_c=0.01 * jax.random.normal(k4, (d_c,), jnp.float32),
    )


if __name__ == "__main__":
    key = jax.random.PRNGKey(0)
    kp, k0, k1 = jax.random.split(key, 3)
    params = init_params(kp)

    B, H, W = 2, 32, 32
    image0 = jax.random.uniform(k0, (B, 1, H, W), jnp.float32)
    image1 = jax.random.uniform(k1, (B, 1, H, W), jnp.float32)

    data = matchformer_forward(image0, image1, params)
    jax.block_until_ready(data['mkpts1_f'])
    jax.block_until_ready(data['conf_matrix'])

    assert data['conf_matrix'].shape == (B, 16, 16)
    assert data['expec_f'].shape == (B * 16, 3)
    assert data['mkpts1_f'].shape == (B * 16, 2)
    print("KERNEL_OK")
</pallas_src>

<mosaic_0001>
module attributes {stable_mosaic.version = 11 : i64} {
  func.func @_linear_kernel(%arg0: i32, %arg1: memref<256x4xbf16, #tpu.memory_space<vmem>>, %arg2: memref<4x32xbf16, #tpu.memory_space<vmem>>, %arg3: memref<1x32xf32, #tpu.memory_space<vmem>>, %arg4: memref<256x32xf32, #tpu.memory_space<vmem>>) attributes {dimension_semantics = [#tpu.dimension_semantics<parallel>], iteration_bounds = array<i64: 4>, scalar_prefetch = 0 : i64, scratch_operands = 0 : i64, tpu.core_type = #tpu.core_type<tc>, window_params = [{transform_indices = @transform_0, window_bounds = array<i64: 256, 4>}, {pipeline_mode = #tpu.pipeline_mode<synchronous>, transform_indices = @transform_1, window_bounds = array<i64: 4, 32>}, {pipeline_mode = #tpu.pipeline_mode<synchronous>, transform_indices = @transform_2, window_bounds = array<i64: 1, 32>}, {transform_indices = @transform_3, window_bounds = array<i64: 256, 32>}]} {
    %c0 = arith.constant 0 : index
    %c0_0 = arith.constant 0 : index
    %0 = vector.load %arg1[%c0, %c0_0] : memref<256x4xbf16, #tpu.memory_space<vmem>>, vector<256x4xbf16>
    %c0_1 = arith.constant 0 : index
    %c0_2 = arith.constant 0 : index
    %1 = vector.load %arg2[%c0_1, %c0_2] : memref<4x32xbf16, #tpu.memory_space<vmem>>, vector<4x32xbf16>
    %cst = arith.constant dense<0.000000e+00> : vector<256x32xf32>
    %2 = tpu.matmul %0, %1, %cst {dimension_numbers = #tpu.dot_dimension_numbers<[1], [0], [0], [1], [0, 0, 1, 1], [], []>} : vector<256x4xbf16>, vector<4x32xbf16>, vector<256x32xf32> -> vector<256x32xf32>
    %c0_3 = arith.constant 0 : index
    %c0_4 = arith.constant 0 : index
    %3 = vector.load %arg3[%c0_3, %c0_4] : memref<1x32xf32, #tpu.memory_space<vmem>>, vector<1x32xf32>
    %4 = vector.broadcast %3 : vector<1x32xf32> to vector<256x32xf32>
    %5 = arith.addf %2, %4 : vector<256x32xf32>
    %cst_5 = arith.constant 0.000000e+00 : f32
    %6 = vector.broadcast %cst_5 : f32 to vector<256x32xf32>
    %7 = arith.maximumf %5, %6 : vector<256x32xf32>
    %c0_6 = arith.constant 0 : index
    %c0_7 = arith.constant 0 : index
    %8 = vector.load %arg4[%c0_6, %c0_7] : memref<256x32xf32, #tpu.memory_space<vmem>>, vector<256x32xf32>
    tpu.vector_store %arg4[%c0_6, %c0_7], %7 {strides = array<i32>} : memref<256x32xf32, #tpu.memory_space<vmem>>, vector<256x32xf32>,
    return
  }
  func.func @transform_0(%arg0: i32) -> (i32, i32) {
    %c0_i32 = arith.constant 0 : i32
    %c0_i32_0 = arith.constant 0 : i32
    return %arg0, %c0_i32 : i32, i32
  }
  func.func @transform_1(%arg0: i32) -> (i32, i32) {
    %c0_i32 = arith.constant 0 : i32
    %c0_i32_0 = arith.constant 0 : i32
    %c0_i32_1 = arith.constant 0 : i32
    return %c0_i32, %c0_i32_0 : i32, i32
  }
  func.func @transform_2(%arg0: i32) -> (i32, i32) {
    %c0_i32 = arith.constant 0 : i32
    %c0_i32_0 = arith.constant 0 : i32
    %c0_i32_1 = arith.constant 0 : i32
    return %c0_i32, %c0_i32_0 : i32, i32
  }
  func.func @transform_3(%arg0: i32) -> (i32, i32) {
    %c0_i32 = arith.constant 0 : i32
    %c0_i32_0 = arith.constant 0 : i32
    return %arg0, %c0_i32 : i32, i32
  }
}

</mosaic_0001>

<bundles_post_ra>
// kernel: tpu_custom_call.1
= control target key start
LH: loop header
LB: loop body
LE: loop exit
PB: predicated region body
PF: predicated region fallthrough
CT: control target
= control target key end

     0   :  { %s781_s12 = smov 0   ;;  %s942_s0 = inlined_call_operand.vmem [shape: bf16[1024,4], index: 0, kind: input, shape index: {}]   ;;  %s943_s1 = inlined_call_operand.vmem [shape: bf16[4,32], index: 1, kind: input, shape index: {}]   ;;  %s944_s2 = inlined_call_operand.vmem [shape: f32[1,32], index: 2, kind: input, shape index: {}]   ;;  %s945_s3 = inlined_call_operand.vmem [shape: f32[1024,32], index: 3, kind: output, shape index: {}]  }
   0x1 LB: > { %s630_s13 = sadd.s32 4294967295, %s759_s12   ;;  %p634_p0 = scmp.ge.s32.totalorder %s759_s12, 1  ;;  %s759_s12 = sphi %s781_s12, %s13_s12  }
   0x2   : > { %p138_p1 = scmp.lt.s32.totalorder %s759_s12, 5 }
   0x4   : > { %p139_p2 = pnand %p634_p0, %p138_p1 }
   0x5   : > { %v207_v0 = vld [vmem:[%s943_s1] sm:$0x3] (!%p139_p2)  ;;  %vm344_vm0 = vcmask (!%p139_p2), 1041408   ;;  %s635_s16 = sshll.u32 (!%p139_p2), %s630_s13, 5  ;;  %vm295_vm1 = vcmask (!%p139_p2), 31744   ;;  %vm541_vm2 = vcmask (!%p139_p2), 261120  }
   0x6   : > { %142 = sbr.rel (%p139_p2) target bundleno = 263 (0x107), region = 32  ;;  %727 = vmatprep.subr.msk.bf16.mxu0 (!%p139_p2), %vm344_vm0, %v207_v0  ;;  %728 = vmatprep.subr.msk.bf16.mxu1 (!%p139_p2), %vm344_vm0, %v207_v0  ;;  %v346_v1 = vsel (!%p139_p2), %vm344_vm0, %v207_v0, 0  ;;  %p163_p3 = scmp.lt.s32.totalorder (!%p139_p2), %s635_s16, 127  ;;  %v835_v18 = vld [vmem:[%s944_s2] ss:$0 sm:$0xff] (!%p139_p2) }
   0x7   : > { %692 = vmatpush3.bf16.msra.mxu0 (!%p139_p2), %v346_v1  ;;  %726 = vmatpush3.bf16.msra.mxu1 (!%p139_p2), %v346_v1 }
   0xd   : > { %s947_s16 = smov (!%p163_p3, %s635_s16), 127 }
   0xe   : > { %s636_s17 = sshll.u32 %s947_s16, 2  ;;  %s638_s23 = sshll.u32 %s947_s16, 3 }
   0xf   : > { %s798_s20 = scalar_lea.vmem %s942_s0, %s636_s17  ;;  %s842_s26 = scalar_lea.vmem %s945_s3, %s638_s23 }
  0x10   : > { %v737_v2 = vld [vmem:[%s798_s20] sm:$0xff]   ;;  %v739_v4 = vld [vmem:[%s798_s20 + $0x8] sm:$0xff]   ;;  %v741_v6 = vld [vmem:[%s798_s20 + $0x10] sm:$0xff]  }
  0x11   : > { %v738_v3 = vld [vmem:[%s798_s20 + $0x40] sm:$0xff]   ;;  %693 = vmatprep.mubr.msk.bf16.mxu0 %vm295_vm1, %v737_v2  ;;  %v740_v5 = vld [vmem:[%s798_s20 + $0x48] sm:$0xff]   ;;  %v742_v7 = vld [vmem:[%s798_s20 + $0x50] sm:$0xff]  }
  0x12   : > { %709 = vmatprep.mubr.msk.bf16.mxu1 %vm295_vm1, %v738_v3  ;;  %694 = vmatmul.mubr.msk.bf16.vlgmr.msra.gmra.mrb[0].mxu0 %vm295_vm1, %v739_v4  ;;  %v743_v8 = vld [vmem:[%s798_s20 + $0x18] sm:$0xff]   ;;  %v745_v10 = vld [vmem:[%s798_s20 + $0x20] sm:$0xff]   ;;  %v747_v12 = vld [vmem:[%s798_s20 + $0x28] sm:$0xff]  }
  0x13   : > { %710 = vmatmul.mubr.msk.bf16.vlgmr.msra.gmra.mrb[0].mxu1 %vm295_vm1, %v740_v5  ;;  %697 = vmatprep.mubr.msk.bf16.mxu0 %vm295_vm1, %v741_v6  ;;  %v744_v9 = vld [vmem:[%s798_s20 + $0x58] sm:$0xff]   ;;  %v746_v11 = vld [vmem:[%s798_s20 + $0x60] sm:$0xff]   ;;  %v748_v13 = vld [vmem:[%s798_s20 + $0x68] sm:$0xff]  }
  0x14   : > { %713 = vmatprep.mubr.msk.bf16.mxu1 %vm295_vm1, %v742_v7  ;;  %v749_v14 = vld [vmem:[%s798_s20 + $0x30] sm:$0xff]   ;;  %v751_v16 = vld [vmem:[%s798_s20 + $0x38] sm:$0xff]  }
  0x15   : > { %v750_v15 = vld [vmem:[%s798_s20 + $0x70] sm:$0xff]   ;;  %v752_v17 = vld [vmem:[%s798_s20 + $0x78] sm:$0xff]  }
  0x1a   : > { %698 = vmatmul.mubr.msk.bf16.gmra.mrb[4].mxu0 %vm295_vm1, %v743_v8 }
  0x1b   : > { %714 = vmatmul.mubr.msk.bf16.gmra.mrb[4].mxu1 %vm295_vm1, %v744_v9  ;;  %701 = vmatprep.mubr.msk.bf16.mxu0 %vm295_vm1, %v745_v10 }
  0x1c   : > { %717 = vmatprep.mubr.msk.bf16.mxu1 %vm295_vm1, %v746_v11 }
  0x22   : > { %702 = vmatmul.mubr.msk.bf16.gmra.mrb[8].mxu0 %vm295_vm1, %v747_v12 }
  0x23   : > { %718 = vmatmul.mubr.msk.bf16.gmra.mrb[8].mxu1 %vm295_vm1, %v748_v13  ;;  %705 = vmatprep.mubr.msk.bf16.mxu0 %vm295_vm1, %v749_v14 }
  0x24   : > { %721 = vmatprep.mubr.msk.bf16.mxu1 %vm295_vm1, %v750_v15 }
  0x2a   : > { %706 = vmatmul.mubr.msk.bf16.gmra.mrb[12].mxu0 %vm295_vm1, %v751_v16 }
  0x2b   : > { %722 = vmatmul.mubr.msk.bf16.gmra.mrb[12].mxu1 %vm295_vm1, %v752_v17 }
  0xe5   : > { %v695_v19 = vpop.f32.mrb[0].mxu0 }
  0xe6   : > { %v391_v20 = vadd.f32 %v695_v19, %v835_v18  ;;  %v711_v21 = vpop.f32.mrb[0].mxu1  ;;  %v382_v22 = vpop.f32.mrb[1].mxu0 }
  0xe7   : > { %v455_v23 = vadd.f32 %v711_v21, %v835_v18  ;;  %v383_v24 = vadd.f32 %v835_v18, %v382_v22  ;;  %v446_v25 = vpop.f32.mrb[1].mxu1  ;;  %v696_v26 = vpop.f32.mrb[2].mxu0 }
  0xe8   : > { %v511_v27 = vmax.f32 %v391_v20, 0.0  ;;  %v447_v28 = vadd.f32 %v835_v18, %v446_v25  ;;  %v394_v29 = vadd.f32 %v696_v26, %v835_v18  ;;  %v712_v30 = vpop.f32.mrb[2].mxu1  ;;  %v385_v31 = vpop.f32.mrb[3].mxu0 }
  0xe9   : > { %v527_v32 = vmax.f32 %v455_v23, 0.0  ;;  %v509_v33 = vmax.f32 %v383_v24, 0.0  ;;  %v458_v34 = vadd.f32 %v712_v30, %v835_v18  ;;  %v386_v35 = vadd.f32 %v835_v18, %v385_v31  ;;  %v449_v36 = vpop.f32.mrb[3].mxu1 }
  0xea   : > { %544 = vst.msk [vmem:[%s842_s26 + $0x10] sm:$0xff] %vm541_vm2, %v511_v27  ;;  %v525_v37 = vmax.f32 %v447_v28, 0.0  ;;  %v512_v38 = vmax.f32 %v394_v29, 0.0  ;;  %v450_v39 = vadd.f32 %v835_v18, %v449_v36 }
  0xeb   : > { %560 = vst.msk [vmem:[%s842_s26 + $0x90] sm:$0xff] %vm541_vm2, %v527_v32  ;;  %542 = vst.msk [vmem:[%s842_s26] sm:$0xff] %vm541_vm2, %v509_v33  ;;  %v528_v40 = vmax.f32 %v458_v34, 0.0  ;;  %v510_v41 = vmax.f32 %v386_v35, 0.0 }
  0xec   : > { %558 = vst.msk [vmem:[%s842_s26 + $0x80] sm:$0xff] %vm541_vm2, %v525_v37  ;;  %545 = vst.msk [vmem:[%s842_s26 + $0x18] sm:$0xff] %vm541_vm2, %v512_v38  ;;  %v526_v42 = vmax.f32 %v450_v39, 0.0 }
  0xed   : > { %561 = vst.msk [vmem:[%s842_s26 + $0x98] sm:$0xff] %vm541_vm2, %v528_v40  ;;  %543 = vst.msk [vmem:[%s842_s26 + $0x8] sm:$0xff] %vm541_vm2, %v510_v41  ;;  %v699_v43 = vpop.f32.mrb[4].mxu0 }
  0xee   : > { %559 = vst.msk [vmem:[%s842_s26 + $0x88] sm:$0xff] %vm541_vm2, %v526_v42  ;;  %v407_v44 = vadd.f32 %v699_v43, %v835_v18  ;;  %v715_v45 = vpop.f32.mrb[4].mxu1  ;;  %v398_v46 = vpop.f32.mrb[5].mxu0 }
  0xef   : > { %v471_v47 = vadd.f32 %v715_v45, %v835_v18  ;;  %v399_v48 = vadd.f32 %v835_v18, %v398_v46  ;;  %v462_v49 = vpop.f32.mrb[5].mxu1  ;;  %v700_v50 = vpop.f32.mrb[6].mxu0 }
  0xf0   : > { %v515_v51 = vmax.f32 %v407_v44, 0.0  ;;  %v463_v52 = vadd.f32 %v835_v18, %v462_v49  ;;  %v410_v53 = vadd.f32 %v700_v50, %v835_v18  ;;  %v716_v54 = vpop.f32.mrb[6].mxu1  ;;  %v401_v55 = vpop.f32.mrb[7].mxu0 }
  0xf1   : > { %v531_v56 = vmax.f32 %v471_v47, 0.0  ;;  %v513_v57 = vmax.f32 %v399_v48, 0.0  ;;  %v474_v58 = vadd.f32 %v716_v54, %v835_v18  ;;  %v402_v59 = vadd.f32 %v835_v18, %v401_v55  ;;  %v465_v60 = vpop.f32.mrb[7].mxu1 }
  0xf2   : > { %548 = vst.msk [vmem:[%s842_s26 + $0x30] sm:$0xff] %vm541_vm2, %v515_v51  ;;  %v529_v61 = vmax.f32 %v463_v52, 0.0  ;;  %v516_v62 = vmax.f32 %v410_v53, 0.0  ;;  %v466_v63 = vadd.f32 %v835_v18, %v465_v60 }
  0xf3   : > { %564 = vst.msk [vmem:[%s842_s26 + $0xb0] sm:$0xff] %vm541_vm2, %v531_v56  ;;  %546 = vst.msk [vmem:[%s842_s26 + $0x20] sm:$0xff] %vm541_vm2, %v513_v57  ;;  %v532_v0 = vmax.f32 %v474_v58, 0.0  ;;  %v514_v1 = vmax.f32 %v402_v59, 0.0 }
  0xf4   : > { %562 = vst.msk [vmem:[%s842_s26 + $0xa0] sm:$0xff] %vm541_vm2, %v529_v61  ;;  %549 = vst.msk [vmem:[%s842_s26 + $0x38] sm:$0xff] %vm541_vm2, %v516_v62  ;;  %v530_v2 = vmax.f32 %v466_v63, 0.0 }
  0xf5   : > { %565 = vst.msk [vmem:[%s842_s26 + $0xb8] sm:$0xff] %vm541_vm2, %v532_v0  ;;  %547 = vst.msk [vmem:[%s842_s26 + $0x28] sm:$0xff] %vm541_vm2, %v514_v1  ;;  %v703_v3 = vpop.f32.mrb[8].mxu0 }
  0xf6   : > { %563 = vst.msk [vmem:[%s842_s26 + $0xa8] sm:$0xff] %vm541_vm2, %v530_v2  ;;  %v423_v4 = vadd.f32 %v703_v3, %v835_v18  ;;  %v719_v5 = vpop.f32.mrb[8].mxu1  ;;  %v414_v6 = vpop.f32.mrb[9].mxu0 }
  0xf7   : > { %v487_v7 = vadd.f32 %v719_v5, %v835_v18  ;;  %v415_v8 = vadd.f32 %v835_v18, %v414_v6  ;;  %v478_v9 = vpop.f32.mrb[9].mxu1  ;;  %v704_v10 = vpop.f32.mrb[10].mxu0 }
  0xf8   : > { %v519_v11 = vmax.f32 %v423_v4, 0.0  ;;  %v479_v12 = vadd.f32 %v835_v18, %v478_v9  ;;  %v426_v13 = vadd.f32 %v704_v10, %v835_v18  ;;  %v720_v14 = vpop.f32.mrb[10].mxu1  ;;  %v417_v15 = vpop.f32.mrb[11].mxu0 }
  0xf9   : > { %v535_v16 = vmax.f32 %v487_v7, 0.0  ;;  %v517_v17 = vmax.f32 %v415_v8, 0.0  ;;  %v490_v19 = vadd.f32 %v720_v14, %v835_v18  ;;  %v418_v20 = vadd.f32 %v835_v18, %v417_v15  ;;  %v481_v21 = vpop.f32.mrb[11].mxu1 }
  0xfa   : > { %552 = vst.msk [vmem:[%s842_s26 + $0x50] sm:$0xff] %vm541_vm2, %v519_v11  ;;  %v533_v22 = vmax.f32 %v479_v12, 0.0  ;;  %v520_v23 = vmax.f32 %v426_v13, 0.0  ;;  %v482_v24 = vadd.f32 %v835_v18, %v481_v21 }
  0xfb   : > { %568 = vst.msk [vmem:[%s842_s26 + $0xd0] sm:$0xff] %vm541_vm2, %v535_v16  ;;  %550 = vst.msk [vmem:[%s842_s26 + $0x40] sm:$0xff] %vm541_vm2, %v517_v17  ;;  %v536_v25 = vmax.f32 %v490_v19, 0.0  ;;  %v518_v26 = vmax.f32 %v418_v20, 0.0 }
  0xfc   : > { %566 = vst.msk [vmem:[%s842_s26 + $0xc0] sm:$0xff] %vm541_vm2, %v533_v22  ;;  %553 = vst.msk [vmem:[%s842_s26 + $0x58] sm:$0xff] %vm541_vm2, %v520_v23  ;;  %v534_v27 = vmax.f32 %v482_v24, 0.0 }
  0xfd   : > { %569 = vst.msk [vmem:[%s842_s26 + $0xd8] sm:$0xff] %vm541_vm2, %v536_v25  ;;  %551 = vst.msk [vmem:[%s842_s26 + $0x48] sm:$0xff] %vm541_vm2, %v518_v26  ;;  %v707_v28 = vpop.f32.mrb[12].mxu0 }
  0xfe   : > { %567 = vst.msk [vmem:[%s842_s26 + $0xc8] sm:$0xff] %vm541_vm2, %v534_v27  ;;  %v439_v29 = vadd.f32 %v707_v28, %v835_v18  ;;  %v723_v30 = vpop.f32.mrb[12].mxu1  ;;  %v430_v31 = vpop.f32.mrb[13].mxu0 }
  0xff   : > { %v503_v32 = vadd.f32 %v723_v30, %v835_v18  ;;  %v431_v33 = vadd.f32 %v835_v18, %v430_v31  ;;  %v494_v34 = vpop.f32.mrb[13].mxu1  ;;  %v708_v35 = vpop.f32.mrb[14].mxu0 }
 0x100   : > { %v523_v36 = vmax.f32 %v439_v29, 0.0  ;;  %v495_v37 = vadd.f32 %v835_v18, %v494_v34  ;;  %v442_v38 = vadd.f32 %v708_v35, %v835_v18  ;;  %v724_v39 = vpop.f32.mrb[14].mxu1  ;;  %v433_v40 = vpop.f32.mrb[15].mxu0 }
 0x101   : > { %v539_v41 = vmax.f32 %v503_v32, 0.0  ;;  %v521_v42 = vmax.f32 %v431_v33, 0.0  ;;  %v506_v43 = vadd.f32 %v724_v39, %v835_v18  ;;  %v434_v44 = vadd.f32 %v835_v18, %v433_v40  ;;  %v497_v45 = vpop.f32.mrb[15].mxu1 }
 0x102   : > { %556 = vst.msk [vmem:[%s842_s26 + $0x70] sm:$0xff] %vm541_vm2, %v523_v36  ;;  %v537_v46 = vmax.f32 %v495_v37, 0.0  ;;  %v524_v47 = vmax.f32 %v442_v38, 0.0  ;;  %v498_v48 = vadd.f32 %v835_v18, %v497_v45 }
 0x103   : > { %572 = vst.msk [vmem:[%s842_s26 + $0xf0] sm:$0xff] %vm541_vm2, %v539_v41  ;;  %554 = vst.msk [vmem:[%s842_s26 + $0x60] sm:$0xff] %vm541_vm2, %v521_v42  ;;  %v540_v49 = vmax.f32 %v506_v43, 0.0  ;;  %v522_v50 = vmax.f32 %v434_v44, 0.0 }
 0x104   : > { %570 = vst.msk [vmem:[%s842_s26 + $0xe0] sm:$0xff] %vm541_vm2, %v537_v46  ;;  %557 = vst.msk [vmem:[%s842_s26 + $0x78] sm:$0xff] %vm541_vm2, %v524_v47  ;;  %v538_v51 = vmax.f32 %v498_v48, 0.0 }
 0x105   : > { %573 = vst.msk [vmem:[%s842_s26 + $0xf8] sm:$0xff] %vm541_vm2, %v540_v49  ;;  %555 = vst.msk [vmem:[%s842_s26 + $0x68] sm:$0xff] %vm541_vm2, %v522_v50 }
 0x106   : > { %571 = vst.msk [vmem:[%s842_s26 + $0xe8] sm:$0xff] %vm541_vm2, %v538_v51 }
 0x107 PF: > { %s13_s12 = sadd.s32 1, %s759_s12  }
 0x108   : > { %p10_p4 = scmp.ge.s32.totalorder %s13_s12, 6  }
 0x10a   :  { %12 = sbr.rel (!%p10_p4) target bundleno = 1 (0x1), region = 62 }

</bundles_post_ra>
